<compile_context>
chip_gen: v6e
topology: v6e:2x2x1
jax: 0.10.0
libtpu: 0.0.40
codegen_flags: <defaults>
</compile_context>

<pallas_src>
import jax
import jax.numpy as jnp
from jax.experimental import pallas as pl
from jax.experimental.pallas import tpu as pltpu


def _dropconnect_kernel(x_ref, s_ref, o_ref):
    # x_ref: (BN, BF) tile of samples-x-features
    # s_ref: (BN, 1)  per-sample pre-scaled mask in f32 (0.0 or 1/keep)
    o_ref[...] = (x_ref[...] * s_ref[...]).astype(o_ref.dtype)


def _round_up(n, m):
    return ((n + m - 1) // m) * m


def dropconnect2(x, ratio, key, training=True, block_n=None, block_f=None):
    """DropConnect2 forward. x: [N, C, H, W] (NCHW, matching PyTorch)."""
    if not training:
        return x

    keep = 1.0 - float(ratio)          # compile-time constant
    inv_keep = 1.0 / keep

    N, C, H, W = x.shape
    CHW = C * H * W
    x2 = x.reshape(N, CHW)             # free: contiguous reshape

    # Per-sample uniform draw (== torch.rand([N,1,1,1])) and pre-scaled mask,
    # computed once in plain JAX glue.  Kept in f32; cast happens in-kernel.
    u = jax.random.uniform(key, (N, 1), dtype=jnp.float32)
    scale = jnp.floor(keep + u) * inv_keep            # (N, 1): 0.0 or 1/keep

    itemsize = jnp.dtype(x.dtype).itemsize
    # Sublane packing: 8 rows for 4-byte, 16 for 2-byte, 32 for 1-byte dtypes.
    sublane = max(8, 32 // max(itemsize, 1))

    if block_n is None:
        BN = min(256, _round_up(N, sublane))
    else:
        BN = block_n
    if block_f is None:
        # Target ~8 MiB per x tile (dtype-aware) so per-step grid overhead is
        # amortized on every generation; clamp to the (128-aligned) full width.
        target_bytes = 8 * 1024 * 1024
        bf = max(128, (target_bytes // (BN * itemsize)) // 128 * 128)
        BF = min(bf, _round_up(CHW, 128))
    else:
        BF = block_f

    grid = (pl.cdiv(N, BN), pl.cdiv(CHW, BF))   # features = fastest axis

    out2 = pl.pallas_call(
        _dropconnect_kernel,
        out_shape=jax.ShapeDtypeStruct((N, CHW), x.dtype),
        grid_spec=pltpu.PrefetchScalarGridSpec(
            num_scalar_prefetch=0,
            grid=grid,
            in_specs=[
                pl.BlockSpec((BN, BF), lambda i, j: (i, j)),
                pl.BlockSpec((BN, 1), lambda i, j: (i, 0)),
            ],
            out_specs=pl.BlockSpec((BN, BF), lambda i, j: (i, j)),
        ),
        compiler_params=pltpu.CompilerParams(
            dimension_semantics=("parallel", "parallel"),
            # ~8 MiB tiles double-buffered in+out ≈ 32 MiB; 48 MiB scoped limit
            # stays under v7x's 64 MiB physical VMEM (and v5e/v6e's 128 MiB).
            vmem_limit_bytes=48 * 1024 * 1024,
        ),
        cost_estimate=pl.CostEstimate(
            flops=N * CHW,
            transcendentals=0,
            bytes_accessed=2 * N * CHW * itemsize + N * 4,
        ),
    )(x2, scale)

    return out2.reshape(N, C, H, W)


if __name__ == "__main__":
    key = jax.random.PRNGKey(0)
    kx, ku = jax.random.split(key)

    N, C, H, W = 2, 4, 16, 16
    x = jax.random.normal(kx, (N, C, H, W), dtype=jnp.float32)
    ratio = 0.3

    out = dropconnect2(x, ratio, ku, training=True)
    out = jax.block_until_ready(out)

    # Correctness check against a pure-JAX reference (same RNG draw).
    keep = 1.0 - ratio
    u = jax.random.uniform(ku, (N, 1), dtype=jnp.float32)
    mask = jnp.floor(keep + u).reshape(N, 1, 1, 1)
    ref = x / keep * mask
    assert jnp.allclose(out, ref, atol=1e-5, rtol=1e-5), "mismatch vs reference"

    # Eval mode is identity.
    out_eval = dropconnect2(x, ratio, ku, training=False)
    assert jnp.allclose(out_eval, x), "eval-mode mismatch"

    print("KERNEL_OK")
</pallas_src>

<mosaic_0001>
module attributes {stable_mosaic.version = 11 : i64} {
  func.func @_dropconnect_kernel(%arg0: i32, %arg1: i32, %arg2: memref<8x1024xf32, #tpu.memory_space<vmem>>, %arg3: memref<8x1xf32, #tpu.memory_space<vmem>>, %arg4: memref<8x1024xf32, #tpu.memory_space<vmem>>) attributes {dimension_semantics = [#tpu.dimension_semantics<parallel>, #tpu.dimension_semantics<parallel>], iteration_bounds = array<i64: 1, 1>, scalar_prefetch = 0 : i64, scratch_operands = 0 : i64, tpu.core_type = #tpu.core_type<tc>, window_params = [{transform_indices = @transform_0, window_bounds = array<i64: 8, 1024>}, {transform_indices = @transform_1, window_bounds = array<i64: 8, 1>}, {transform_indices = @transform_2, window_bounds = array<i64: 8, 1024>}]} {
    %c0 = arith.constant 0 : index
    %c0_0 = arith.constant 0 : index
    %0 = vector.load %arg2[%c0, %c0_0] : memref<8x1024xf32, #tpu.memory_space<vmem>>, vector<8x1024xf32>
    %c0_1 = arith.constant 0 : index
    %c0_2 = arith.constant 0 : index
    %1 = vector.load %arg3[%c0_1, %c0_2] : memref<8x1xf32, #tpu.memory_space<vmem>>, vector<8x1xf32>
    %2 = vector.broadcast %1 : vector<8x1xf32> to vector<8x1024xf32>
    %3 = arith.mulf %0, %2 : vector<8x1024xf32>
    %c0_3 = arith.constant 0 : index
    %c0_4 = arith.constant 0 : index
    %4 = vector.load %arg4[%c0_3, %c0_4] : memref<8x1024xf32, #tpu.memory_space<vmem>>, vector<8x1024xf32>
    tpu.vector_store %arg4[%c0_3, %c0_4], %3 {strides = array<i32>} : memref<8x1024xf32, #tpu.memory_space<vmem>>, vector<8x1024xf32>,
    return
  }
  func.func @transform_0(%arg0: i32, %arg1: i32) -> (i32, i32) {
    %c0_i32 = arith.constant 0 : i32
    return %arg0, %arg1 : i32, i32
  }
  func.func @transform_1(%arg0: i32, %arg1: i32) -> (i32, i32) {
    %c0_i32 = arith.constant 0 : i32
    %c0_i32_0 = arith.constant 0 : i32
    return %arg0, %c0_i32 : i32, i32
  }
  func.func @transform_2(%arg0: i32, %arg1: i32) -> (i32, i32) {
    %c0_i32 = arith.constant 0 : i32
    return %arg0, %arg1 : i32, i32
  }
}

</mosaic_0001>

<bundles_post_ra>
// kernel: tpu_custom_call.1
= control target key start
LH: loop header
LB: loop body
LE: loop exit
PB: predicated region body
PF: predicated region fallthrough
CT: control target
= control target key end

     0   :  { %7 = vsyncpa [#allocation3], 0  ;;  %s197_s0 = inlined_call_operand.hbm [shape: f32[2,1024], index: 0, kind: input, shape index: {}]   ;;  %s198_s1 = inlined_call_operand.vmem [shape: f32[2,1], index: 1, kind: input, shape index: {}]   ;;  %s199_s2 = inlined_call_operand.hbm [shape: f32[2,1024], index: 2, kind: output, shape index: {}]  }
   0x1   :  { %8 = vsyncpa [#allocation4], 0 }
   0x2   :  { %13 = vsyncadd [#allocation3], 768  ;;  %s158_s9 = smov [#allocation2]  }
   0x3   :  { %s14_s10 = sshll.u32 %s158_s9, 4  ;;  %s15_s10 = int_to_ptr.vmem [resolvable:$true] %s14_s10 }
   0x4   :  { %s122_s11 = scalar_lea.vmem %s15_s10, 256  ;;  %s126_s12 = scalar_lea.vmem %s15_s10, 1024 }
   0x5   :  { %p123_p0 = scmp.ne.s32.totalorder %s15_s10, %s122_s11  ;;  %p127_p1 = scmp.lt.s32.totalorder %s15_s10, %s15_s10 }
   0x6   :  { %p128_p2 = scmp.lt.s32.totalorder %s126_s12, %s122_s11 }
   0x8   :  { %p129_p3 = por %p128_p2, %p127_p1 }
   0xa   :  { %p130_p4 = pnand %p129_p3, %p123_p0 }
   0xc   :  { %133 = shalt.err (!%p130_p4)
}
   0xd   :  { %s159_s13 = smov 256   ;;  %s160_s14 = smov 16  }
   0xe   :  { %20 = dma.hbm_to_vmem [thread:$0]  %s197_s0, 256, %s15_s10, [#allocation3], %s159_s13, %s159_s13, %s160_s14  }
   0xf   :  { %154 = dma.done.wait [#allocation3], 1024  }
  0x10   :  { %155 = vsyncadd [#allocation3], 4294966272  ;;  %v161_v0 = vmov 0   ;;  %v34_v1 = vld [vmem:[%s198_s1] sm:$0xff]  ;;  %v42_v2 = vlaneseq  ;;  %v162_v3 = vmov 269488144  }
  0x11   :  { %113 = vset.pattern.permute.xlu0 %v161_v0  ;;  %v40_v4 = vunpack.c.l.s4 %v162_v3  ;;  %v163_v5 = vmov 842150450   ;;  %v164_v7 = vmov 1414812756   ;;  %v165_v9 = vmov 1987475062  }
  0x12   :  { %37 = vperm.xlu0 %113, %v34_v1   ;;  %v47_v6 = vunpack.c.l.s4 %v163_v5  ;;  %v54_v8 = vunpack.c.l.s4 %v164_v7  ;;  %v61_v10 = vunpack.c.l.s4 %v165_v9  ;;  %v43_v11 = vshrl.u32 %v42_v2, 7  ;;  %v26_v20 = vld [vmem:[#allocation2] sm:$0xff]  ;;  %v27_v21 = vld [vmem:[#allocation2 + $0x8] sm:$0xff]  ;;  %v28_v23 = vld [vmem:[#allocation2 + $0x10] sm:$0xff] }
  0x13   :  { %v41_v12 = vunpack.c.0.s8 %v40_v4  ;;  %v29_v24 = vld [vmem:[#allocation2 + $0x18] sm:$0xff]  ;;  %v30_v25 = vld [vmem:[#allocation2 + $0x20] sm:$0xff]  ;;  %v31_v26 = vld [vmem:[#allocation2 + $0x28] sm:$0xff] }
  0x14   :  { %v48_v13 = vunpack.c.0.s8 %v47_v6  ;;  %v55_v14 = vunpack.c.0.s8 %v54_v8  ;;  %v62_v15 = vunpack.c.0.s8 %v61_v10  ;;  %v32_v27 = vld [vmem:[#allocation2 + $0x30] sm:$0xff]  ;;  %v33_v28 = vld [vmem:[#allocation2 + $0x38] sm:$0xff] }
  0x15   :  { %v44_v16 = vsub.s32 %v41_v12, %v43_v11 }
  0x16   :  { %v51_v17 = vsub.s32 %v48_v13, %v43_v11  ;;  %v58_v18 = vsub.s32 %v55_v14, %v43_v11  ;;  %v65_v19 = vsub.s32 %v62_v15, %v43_v11 }
  0x8d   :  { %v38_v22 = vpop.permute.xlu0 %37 }
  0x8e   :  { %v45_v29 = vrot.slane %v38_v22, %v44_v16  ;;  %v52_v30 = vrot.slane %v38_v22, %v51_v17  ;;  %v59_v31 = vrot.slane %v38_v22, %v58_v18  ;;  %v66_v32 = vrot.slane %v38_v22, %v65_v19 }
  0x90   :  { %v71_v33 = vmul.f32 %v45_v29, %v26_v20  ;;  %v72_v34 = vmul.f32 %v45_v29, %v27_v21  ;;  %v73_v35 = vmul.f32 %v52_v30, %v28_v23  ;;  %v74_v36 = vmul.f32 %v52_v30, %v29_v24 }
  0x91   :  { %v75_v37 = vmul.f32 %v59_v31, %v30_v25  ;;  %v76_v38 = vmul.f32 %v59_v31, %v31_v26  ;;  %v77_v39 = vmul.f32 %v66_v32, %v32_v27  ;;  %v78_v40 = vmul.f32 %v66_v32, %v33_v28 }
  0x92   :  { %79 = vst [vmem:[#allocation5] sm:$0xff] %v71_v33  ;;  %80 = vst [vmem:[#allocation5 + $0x8] sm:$0xff] %v72_v34 }
  0x93   :  { %81 = vst [vmem:[#allocation5 + $0x10] sm:$0xff] %v73_v35  ;;  %82 = vst [vmem:[#allocation5 + $0x18] sm:$0xff] %v74_v36 }
  0x94   :  { %83 = vst [vmem:[#allocation5 + $0x20] sm:$0xff] %v75_v37  ;;  %84 = vst [vmem:[#allocation5 + $0x28] sm:$0xff] %v76_v38 }
  0x95   :  { %85 = vst [vmem:[#allocation5 + $0x30] sm:$0xff] %v77_v39  ;;  %86 = vst [vmem:[#allocation5 + $0x38] sm:$0xff] %v78_v40 }
  0x96   :  { %91 = vsyncadd [#allocation4], 768  ;;  %s166_s0 = smov [#allocation5]  }
  0x97   :  { %s92_s1 = sshll.u32 %s166_s0, 4  ;;  %s93_s1 = int_to_ptr.vmem [resolvable:$true] %s92_s1 }
  0x98   :  { %s134_s19 = scalar_lea.vmem %s93_s1, 256  ;;  %s138_s20 = scalar_lea.vmem %s93_s1, 1024 }
  0x99   :  { %p135_p5 = scmp.ne.s32.totalorder %s93_s1, %s134_s19  ;;  %p139_p6 = scmp.lt.s32.totalorder %s93_s1, %s93_s1 }
  0x9a   :  { %p140_p7 = scmp.lt.s32.totalorder %s138_s20, %s134_s19 }
  0x9c   :  { %p141_p8 = por %p140_p7, %p139_p6 }
  0x9e   :  { %p142_p9 = pnand %p141_p8, %p135_p5 }
  0xa0   :  { %145 = shalt.err (!%p142_p9)
}
  0xa1   :  { %98 = dma.vmem_to_hbm [thread:$0]  %s93_s1, 256, %s199_s2, [#allocation4], %s159_s13, %s159_s13, %s160_s14  }
  0xa2   :  { %156 = dma.done.wait [#allocation4], 1024  }
  0xa3   :  { %157 = vsyncadd [#allocation4], 4294966272 }
  0xa4   :  { %102 = vsyncpa [#allocation3], 1 }
  0xa5   :  { %103 = vsyncpa [#allocation4], 1 }

</bundles_post_ra>
